<compile_context>
chip_gen: v6e
topology: v6e:2x2x1
jax: 0.10.0
libtpu: 0.0.40
codegen_flags: <defaults>
</compile_context>

<pallas_src>
import jax
import jax.numpy as jnp
from jax.experimental import pallas as pl
from jax.experimental.pallas import tpu as pltpu

# ----------------------------- model config ---------------------------------
CUST_NUM = 50
PROD_NUM = 37
FEATURE_NUM = 8          # F
NUM_LAYERS = 3           # L  -> MLP embedding dim = F * 2**(L-1) = 32
MLP_EMB = FEATURE_NUM * 2 ** (NUM_LAYERS - 1)      # 32
MLP_IN = 2 * MLP_EMB                               # 64 (concat cust||prod)
# MLP tower dims: 64 -> 32 -> 16 -> 8
BATCH = 16


def _pad_rows(a, mult=8):
    """Zero-pad the leading (row) dim up to a multiple of `mult`."""
    pad = (-a.shape[0]) % mult
    if pad:
        a = jnp.pad(a, ((0, pad), (0, 0)))
    return a


# ------------------------------- kernel -------------------------------------
def ncf_kernel(idx_ref,                                  # (B, 2) int32, VMEM
               ec_gmf_ref, ep_gmf_ref,                   # padded GMF tables
               ecm_ref, epm_ref,                         # padded MLP tables pre-projected by w0
               w1_ref, w2_ref,                           # tower weights
               pack_ref,                                 # (8, 128) packed small params
               out_ref):                                 # (B, 1)
    idx = idx_ref[...]                                   # (B, 2) int32
    cust = idx[:, 0:1]                                   # (B, 1)
    prod = idx[:, 1:2]                                   # (B, 1)
    B = idx.shape[0]

    # ---- one-hot MXU gather (no scalar loop, no scratch round-trip) ----
    oh_c = (jax.lax.broadcasted_iota(jnp.int32, (B, ec_gmf_ref.shape[0]), 1)
            == cust).astype(jnp.float32)                 # (B, CUST_PAD)
    oh_p = (jax.lax.broadcasted_iota(jnp.int32, (B, ep_gmf_ref.shape[0]), 1)
            == prod).astype(jnp.float32)                 # (B, PROD_PAD)

    gmf = (jnp.dot(oh_c, ec_gmf_ref[...], preferred_element_type=jnp.float32)
           * jnp.dot(oh_p, ep_gmf_ref[...], preferred_element_type=jnp.float32))  # (B, F)

    # ---- packed small params (static lane slices) ----
    b0     = pack_ref[0:1, 0:MLP_EMB]          # (1, 32)
    b1     = pack_ref[1:2, 0:MLP_EMB // 2]     # (1, 16)
    b2     = pack_ref[2:3, 0:FEATURE_NUM]      # (1, 8)
    wn_gmf = pack_ref[3:4, 0:FEATURE_NUM]      # (1, 8)
    wn_mlp = pack_ref[4:5, 0:FEATURE_NUM]      # (1, 8)
    bn     = pack_ref[5:6, 0:1]                # (1, 1)

    # ---- MLP tower (dropout == identity in eval); layer 0 is the pre-projected gather ----
    h = jnp.maximum(
        jnp.dot(oh_c, ecm_ref[...], preferred_element_type=jnp.float32)
        + jnp.dot(oh_p, epm_ref[...], preferred_element_type=jnp.float32)
        + b0, 0.0)                                                          # (B, 32)
    h = jnp.maximum(
        jnp.dot(h, w1_ref[...], preferred_element_type=jnp.float32) + b1, 0.0)   # (B, 16)
    h = jnp.maximum(
        jnp.dot(h, w2_ref[...], preferred_element_type=jnp.float32) + b2, 0.0)   # (B, 8)

    # ---- NeuMF head as VPU mul + lane reduction ----
    # cat(gmf, h) @ wn + bn == sum(gmf * wn[:F]^T + h * wn[F:]^T, -1) + bn
    head = gmf * wn_gmf + h * wn_mlp                                        # (B, F)
    out_ref[...] = jnp.sum(head, axis=-1, keepdims=True) + bn               # (B, 1)


# --------------------------- param preparation -------------------------------
def prepare_ncf_params(params):
    """One-time folding/packing of the PyTorch-style params for the kernel."""
    F = FEATURE_NUM
    w0, b0 = params["w0"], params["b0"]          # (64,32), (1,32)
    w1, b1 = params["w1"], params["b1"]          # (32,16), (1,16)
    w2, b2 = params["w2"], params["b2"]          # (16, 8), (1, 8)
    wn, bn = params["wn"], params["bn"]          # (2F,1),  (1, 1)

    w0c, w0p = w0[:MLP_EMB], w0[MLP_EMB:]        # (32,32), (32,32)

    ec_gmf = _pad_rows(params["embed_cust_GMF"].astype(jnp.float32))   # (56, 8)
    ep_gmf = _pad_rows(params["embed_prod_GMF"].astype(jnp.float32))   # (40, 8)
    # Fold layer-0 weights into the MLP embedding tables (gather is linear).
    ecm = _pad_rows(params["embed_cust_MLP"].astype(jnp.float32) @ w0c)   # (56, 32)
    epm = _pad_rows(params["embed_prod_MLP"].astype(jnp.float32) @ w0p)   # (40, 32)

    # Pack the small vectors into a single (8, 128) f32 buffer.
    pack = jnp.zeros((8, 128), jnp.float32)
    pack = pack.at[0, :MLP_EMB].set(b0.reshape(-1))
    pack = pack.at[1, :MLP_EMB // 2].set(b1.reshape(-1))
    pack = pack.at[2, :F].set(b2.reshape(-1))
    pack = pack.at[3, :F].set(wn[:F, 0])
    pack = pack.at[4, :F].set(wn[F:, 0])
    pack = pack.at[5, 0].set(bn[0, 0])

    return dict(ec_gmf=ec_gmf, ep_gmf=ep_gmf, ecm=ecm, epm=epm,
                w1=w1.astype(jnp.float32), w2=w2.astype(jnp.float32), pack=pack)


# ------------------------------- wrapper -------------------------------------
def ncf_forward(prepared, cust, prod):
    B = cust.shape[0]
    idx = jnp.stack([cust.astype(jnp.int32), prod.astype(jnp.int32)], axis=1)  # (B, 2)

    args = (idx,
            prepared["ec_gmf"], prepared["ep_gmf"],
            prepared["ecm"], prepared["epm"],
            prepared["w1"], prepared["w2"],
            prepared["pack"])

    # Full-array VMEM blocks (block == full shape, so no (8,128) constraint).
    def full(a):
        return pl.BlockSpec(a.shape, lambda i: (0,) * a.ndim)

    flops = 2 * B * (prepared["ec_gmf"].shape[0] * (FEATURE_NUM + MLP_EMB)
                     + prepared["ep_gmf"].shape[0] * (FEATURE_NUM + MLP_EMB)
                     + MLP_EMB * (MLP_EMB // 2)
                     + (MLP_EMB // 2) * FEATURE_NUM)
    bytes_accessed = sum(int(a.size) * a.dtype.itemsize for a in args) + B * 4

    out = pl.pallas_call(
        ncf_kernel,
        out_shape=jax.ShapeDtypeStruct((B, 1), jnp.float32),
        grid_spec=pl.GridSpec(
            grid=(1,),                           # whole batch in one step
            in_specs=[full(a) for a in args],
            out_specs=pl.BlockSpec((B, 1), lambda i: (0, 0)),
        ),
        compiler_params=pltpu.CompilerParams(
            dimension_semantics=("arbitrary",)),
        cost_estimate=pl.CostEstimate(flops=flops, transcendentals=0,
                                      bytes_accessed=bytes_accessed),
    )(*args)

    return out.reshape(-1)              # matches final.view(-1)


# --------------------------- parameter init ----------------------------------
def init_params(key):
    ks = jax.random.split(key, 12)
    scale = 0.1
    p = {}
    p["embed_cust_GMF"] = scale * jax.random.normal(ks[0], (CUST_NUM, FEATURE_NUM), jnp.float32)
    p["embed_prod_GMF"] = scale * jax.random.normal(ks[1], (PROD_NUM, FEATURE_NUM), jnp.float32)
    p["embed_cust_MLP"] = scale * jax.random.normal(ks[2], (CUST_NUM, MLP_EMB), jnp.float32)
    p["embed_prod_MLP"] = scale * jax.random.normal(ks[3], (PROD_NUM, MLP_EMB), jnp.float32)
    # MLP tower: layer i has input F * 2**(L-i), output half of that.
    dims_in = [FEATURE_NUM * 2 ** (NUM_LAYERS - i) for i in range(NUM_LAYERS)]   # [64, 32, 16]
    for i, din in enumerate(dims_in):
        dout = din // 2
        p[f"w{i}"] = scale * jax.random.normal(ks[4 + 2 * i], (din, dout), jnp.float32)
        p[f"b{i}"] = scale * jax.random.normal(ks[5 + 2 * i], (1, dout), jnp.float32)
    p["wn"] = scale * jax.random.normal(ks[10], (2 * FEATURE_NUM, 1), jnp.float32)
    p["bn"] = scale * jax.random.normal(ks[11], (1, 1), jnp.float32)
    return p


# ------------------------------- reference -----------------------------------
def ncf_reference(params, cust, prod):
    gmf = params["embed_cust_GMF"][cust] * params["embed_prod_GMF"][prod]
    h = jnp.concatenate(
        [params["embed_cust_MLP"][cust], params["embed_prod_MLP"][prod]], axis=-1)
    for i in range(NUM_LAYERS):
        h = jnp.maximum(h @ params[f"w{i}"] + params[f"b{i}"], 0.0)
    final = jnp.concatenate([gmf, h], axis=-1) @ params["wn"] + params["bn"]
    return final.reshape(-1)


# --------------------------------- main ---------------------------------------
if __name__ == "__main__":
    key = jax.random.PRNGKey(0)
    kp, kc, kr = jax.random.split(key, 3)
    params = init_params(kp)
    prepared = prepare_ncf_params(params)

    cust = jax.random.randint(kc, (BATCH,), 0, CUST_NUM, dtype=jnp.int32)
    prod = jax.random.randint(kr, (BATCH,), 0, PROD_NUM, dtype=jnp.int32)

    out = ncf_forward(prepared, cust, prod)
    out = jax.block_until_ready(out)

    ref = ncf_reference(params, cust, prod)
    assert out.shape == (BATCH,), out.shape
    assert jnp.allclose(out, ref, atol=1e-5, rtol=1e-5), (out, ref)

    print("KERNEL_OK")
</pallas_src>

<mosaic_0001>
module attributes {stable_mosaic.version = 11 : i64} {
  func.func @ncf_kernel(%arg0: i32, %arg1: memref<16x2xi32, #tpu.memory_space<vmem>>, %arg2: memref<56x8xf32, #tpu.memory_space<vmem>>, %arg3: memref<40x8xf32, #tpu.memory_space<vmem>>, %arg4: memref<56x32xf32, #tpu.memory_space<vmem>>, %arg5: memref<40x32xf32, #tpu.memory_space<vmem>>, %arg6: memref<32x16xf32, #tpu.memory_space<vmem>>, %arg7: memref<16x8xf32, #tpu.memory_space<vmem>>, %arg8: memref<8x128xf32, #tpu.memory_space<vmem>>, %arg9: memref<16x1xf32, #tpu.memory_space<vmem>>) attributes {dimension_semantics = [#tpu.dimension_semantics<arbitrary>], iteration_bounds = array<i64: 1>, scalar_prefetch = 0 : i64, scratch_operands = 0 : i64, tpu.core_type = #tpu.core_type<tc>, window_params = [{pipeline_mode = #tpu.pipeline_mode<synchronous>, transform_indices = @transform_0, window_bounds = array<i64: 16, 2>}, {pipeline_mode = #tpu.pipeline_mode<synchronous>, transform_indices = @transform_1, window_bounds = array<i64: 56, 8>}, {pipeline_mode = #tpu.pipeline_mode<synchronous>, transform_indices = @transform_2, window_bounds = array<i64: 40, 8>}, {pipeline_mode = #tpu.pipeline_mode<synchronous>, transform_indices = @transform_3, window_bounds = array<i64: 56, 32>}, {pipeline_mode = #tpu.pipeline_mode<synchronous>, transform_indices = @transform_4, window_bounds = array<i64: 40, 32>}, {pipeline_mode = #tpu.pipeline_mode<synchronous>, transform_indices = @transform_5, window_bounds = array<i64: 32, 16>}, {pipeline_mode = #tpu.pipeline_mode<synchronous>, transform_indices = @transform_6, window_bounds = array<i64: 16, 8>}, {pipeline_mode = #tpu.pipeline_mode<synchronous>, transform_indices = @transform_7, window_bounds = array<i64: 8, 128>}, {pipeline_mode = #tpu.pipeline_mode<synchronous>, transform_indices = @transform_8, window_bounds = array<i64: 16, 1>}]} {
    %c0 = arith.constant 0 : index
    %c0_0 = arith.constant 0 : index
    %0 = vector.load %arg1[%c0, %c0_0] : memref<16x2xi32, #tpu.memory_space<vmem>>, vector<16x2xi32>
    %1 = vector.extract_strided_slice %0 {offsets = [0, 0], sizes = [16, 1], strides = [1, 1]} : vector<16x2xi32> to vector<16x1xi32>
    %2 = vector.extract_strided_slice %0 {offsets = [0, 1], sizes = [16, 1], strides = [1, 1]} : vector<16x2xi32> to vector<16x1xi32>
    %3 = tpu.iota {dimensions = array<i32: 1>} : vector<16x56xi32>
    %4 = vector.broadcast %1 : vector<16x1xi32> to vector<16x56xi32>
    %5 = arith.cmpi eq, %3, %4 : vector<16x56xi32>
    %6 = arith.extui %5 : vector<16x56xi1> to vector<16x56xi32>
    %7 = arith.sitofp %6 : vector<16x56xi32> to vector<16x56xf32>
    %8 = tpu.iota {dimensions = array<i32: 1>} : vector<16x40xi32>
    %9 = vector.broadcast %2 : vector<16x1xi32> to vector<16x40xi32>
    %10 = arith.cmpi eq, %8, %9 : vector<16x40xi32>
    %11 = arith.extui %10 : vector<16x40xi1> to vector<16x40xi32>
    %12 = arith.sitofp %11 : vector<16x40xi32> to vector<16x40xf32>
    %c0_1 = arith.constant 0 : index
    %c0_2 = arith.constant 0 : index
    %13 = vector.load %arg2[%c0_1, %c0_2] : memref<56x8xf32, #tpu.memory_space<vmem>>, vector<56x8xf32>
    %cst = arith.constant dense<0.000000e+00> : vector<16x8xf32>
    %14 = tpu.matmul %7, %13, %cst {dimension_numbers = #tpu.dot_dimension_numbers<[1], [0], [0], [1], [0, 0, 1, 1], [], []>} : vector<16x56xf32>, vector<56x8xf32>, vector<16x8xf32> -> vector<16x8xf32>
    %c0_3 = arith.constant 0 : index
    %c0_4 = arith.constant 0 : index
    %15 = vector.load %arg3[%c0_3, %c0_4] : memref<40x8xf32, #tpu.memory_space<vmem>>, vector<40x8xf32>
    %cst_5 = arith.constant dense<0.000000e+00> : vector<16x8xf32>
    %16 = tpu.matmul %12, %15, %cst_5 {dimension_numbers = #tpu.dot_dimension_numbers<[1], [0], [0], [1], [0, 0, 1, 1], [], []>} : vector<16x40xf32>, vector<40x8xf32>, vector<16x8xf32> -> vector<16x8xf32>
    %17 = arith.mulf %14, %16 : vector<16x8xf32>
    %c0_6 = arith.constant 0 : index
    %c0_7 = arith.constant 0 : index
    %18 = vector.load %arg8[%c0_6, %c0_7] : memref<8x128xf32, #tpu.memory_space<vmem>>, vector<1x32xf32>
    %c1 = arith.constant 1 : index
    %c0_8 = arith.constant 0 : index
    %19 = vector.load %arg8[%c1, %c0_8] : memref<8x128xf32, #tpu.memory_space<vmem>>, vector<1x16xf32>
    %c2 = arith.constant 2 : index
    %c0_9 = arith.constant 0 : index
    %20 = vector.load %arg8[%c2, %c0_9] : memref<8x128xf32, #tpu.memory_space<vmem>>, vector<1x8xf32>
    %c3 = arith.constant 3 : index
    %c0_10 = arith.constant 0 : index
    %21 = vector.load %arg8[%c3, %c0_10] : memref<8x128xf32, #tpu.memory_space<vmem>>, vector<1x8xf32>
    %c4 = arith.constant 4 : index
    %c0_11 = arith.constant 0 : index
    %22 = vector.load %arg8[%c4, %c0_11] : memref<8x128xf32, #tpu.memory_space<vmem>>, vector<1x8xf32>
    %c5 = arith.constant 5 : index
    %c0_12 = arith.constant 0 : index
    %23 = vector.load %arg8[%c5, %c0_12] : memref<8x128xf32, #tpu.memory_space<vmem>>, vector<1x1xf32>
    %c0_13 = arith.constant 0 : index
    %c0_14 = arith.constant 0 : index
    %24 = vector.load %arg4[%c0_13, %c0_14] : memref<56x32xf32, #tpu.memory_space<vmem>>, vector<56x32xf32>
    %cst_15 = arith.constant dense<0.000000e+00> : vector<16x32xf32>
    %25 = tpu.matmul %7, %24, %cst_15 {dimension_numbers = #tpu.dot_dimension_numbers<[1], [0], [0], [1], [0, 0, 1, 1], [], []>} : vector<16x56xf32>, vector<56x32xf32>, vector<16x32xf32> -> vector<16x32xf32>
    %c0_16 = arith.constant 0 : index
    %c0_17 = arith.constant 0 : index
    %26 = vector.load %arg5[%c0_16, %c0_17] : memref<40x32xf32, #tpu.memory_space<vmem>>, vector<40x32xf32>
    %cst_18 = arith.constant dense<0.000000e+00> : vector<16x32xf32>
    %27 = tpu.matmul %12, %26, %cst_18 {dimension_numbers = #tpu.dot_dimension_numbers<[1], [0], [0], [1], [0, 0, 1, 1], [], []>} : vector<16x40xf32>, vector<40x32xf32>, vector<16x32xf32> -> vector<16x32xf32>
    %28 = arith.addf %25, %27 : vector<16x32xf32>
    %29 = vector.broadcast %18 : vector<1x32xf32> to vector<16x32xf32>
    %30 = arith.addf %28, %29 : vector<16x32xf32>
    %cst_19 = arith.constant 0.000000e+00 : f32
    %31 = vector.broadcast %cst_19 : f32 to vector<16x32xf32>
    %32 = arith.maximumf %30, %31 : vector<16x32xf32>
    %c0_20 = arith.constant 0 : index
    %c0_21 = arith.constant 0 : index
    %33 = vector.load %arg6[%c0_20, %c0_21] : memref<32x16xf32, #tpu.memory_space<vmem>>, vector<32x16xf32>
    %cst_22 = arith.constant dense<0.000000e+00> : vector<16x16xf32>
    %34 = tpu.matmul %32, %33, %cst_22 {dimension_numbers = #tpu.dot_dimension_numbers<[1], [0], [0], [1], [0, 0, 1, 1], [], []>} : vector<16x32xf32>, vector<32x16xf32>, vector<16x16xf32> -> vector<16x16xf32>
    %35 = vector.broadcast %19 : vector<1x16xf32> to vector<16x16xf32>
    %36 = arith.addf %34, %35 : vector<16x16xf32>
    %cst_23 = arith.constant 0.000000e+00 : f32
    %37 = vector.broadcast %cst_23 : f32 to vector<16x16xf32>
    %38 = arith.maximumf %36, %37 : vector<16x16xf32>
    %c0_24 = arith.constant 0 : index
    %c0_25 = arith.constant 0 : index
    %39 = vector.load %arg7[%c0_24, %c0_25] : memref<16x8xf32, #tpu.memory_space<vmem>>, vector<16x8xf32>
    %cst_26 = arith.constant dense<0.000000e+00> : vector<16x8xf32>
    %40 = tpu.matmul %38, %39, %cst_26 {dimension_numbers = #tpu.dot_dimension_numbers<[1], [0], [0], [1], [0, 0, 1, 1], [], []>} : vector<16x16xf32>, vector<16x8xf32>, vector<16x8xf32> -> vector<16x8xf32>
    %41 = vector.broadcast %20 : vector<1x8xf32> to vector<16x8xf32>
    %42 = arith.addf %40, %41 : vector<16x8xf32>
    %cst_27 = arith.constant 0.000000e+00 : f32
    %43 = vector.broadcast %cst_27 : f32 to vector<16x8xf32>
    %44 = arith.maximumf %42, %43 : vector<16x8xf32>
    %45 = vector.broadcast %21 : vector<1x8xf32> to vector<16x8xf32>
    %46 = arith.mulf %17, %45 : vector<16x8xf32>
    %47 = vector.broadcast %22 : vector<1x8xf32> to vector<16x8xf32>
    %48 = arith.mulf %44, %47 : vector<16x8xf32>
    %49 = arith.addf %46, %48 : vector<16x8xf32>
    %cst_28 = arith.constant dense<0.000000e+00> : vector<16xf32>
    %50 = vector.multi_reduction <add>, %49, %cst_28 [1] : vector<16x8xf32> to vector<16xf32>
    %51 = vector.shape_cast %50 : vector<16xf32> to vector<16x1xf32>
    %52 = vector.broadcast %23 : vector<1x1xf32> to vector<16x1xf32>
    %53 = arith.addf %51, %52 : vector<16x1xf32>
    %c0_29 = arith.constant 0 : index
    %c0_30 = arith.constant 0 : index
    %54 = vector.load %arg9[%c0_29, %c0_30] : memref<16x1xf32, #tpu.memory_space<vmem>>, vector<16x1xf32>
    tpu.vector_store %arg9[%c0_29, %c0_30], %53 {strides = array<i32>} : memref<16x1xf32, #tpu.memory_space<vmem>>, vector<16x1xf32>,
    return
  }
  func.func @transform_0(%arg0: i32) -> (i32, i32) {
    %c0_i32 = arith.constant 0 : i32
    %c0_i32_0 = arith.constant 0 : i32
    %c0_i32_1 = arith.constant 0 : i32
    return %c0_i32, %c0_i32_0 : i32, i32
  }
  func.func @transform_1(%arg0: i32) -> (i32, i32) {
    %c0_i32 = arith.constant 0 : i32
    %c0_i32_0 = arith.constant 0 : i32
    %c0_i32_1 = arith.constant 0 : i32
    return %c0_i32, %c0_i32_0 : i32, i32
  }
  func.func @transform_2(%arg0: i32) -> (i32, i32) {
    %c0_i32 = arith.constant 0 : i32
    %c0_i32_0 = arith.constant 0 : i32
    %c0_i32_1 = arith.constant 0 : i32
    return %c0_i32, %c0_i32_0 : i32, i32
  }
  func.func @transform_3(%arg0: i32) -> (i32, i32) {
    %c0_i32 = arith.constant 0 : i32
    %c0_i32_0 = arith.constant 0 : i32
    %c0_i32_1 = arith.constant 0 : i32
    return %c0_i32, %c0_i32_0 : i32, i32
  }
  func.func @transform_4(%arg0: i32) -> (i32, i32) {
    %c0_i32 = arith.constant 0 : i32
    %c0_i32_0 = arith.constant 0 : i32
    %c0_i32_1 = arith.constant 0 : i32
    return %c0_i32, %c0_i32_0 : i32, i32
  }
  func.func @transform_5(%arg0: i32) -> (i32, i32) {
    %c0_i32 = arith.constant 0 : i32
    %c0_i32_0 = arith.constant 0 : i32
    %c0_i32_1 = arith.constant 0 : i32
    return %c0_i32, %c0_i32_0 : i32, i32
  }
  func.func @transform_6(%arg0: i32) -> (i32, i32) {
    %c0_i32 = arith.constant 0 : i32
    %c0_i32_0 = arith.constant 0 : i32
    %c0_i32_1 = arith.constant 0 : i32
    return %c0_i32, %c0_i32_0 : i32, i32
  }
  func.func @transform_7(%arg0: i32) -> (i32, i32) {
    %c0_i32 = arith.constant 0 : i32
    %c0_i32_0 = arith.constant 0 : i32
    %c0_i32_1 = arith.constant 0 : i32
    return %c0_i32, %c0_i32_0 : i32, i32
  }
  func.func @transform_8(%arg0: i32) -> (i32, i32) {
    %c0_i32 = arith.constant 0 : i32
    %c0_i32_0 = arith.constant 0 : i32
    %c0_i32_1 = arith.constant 0 : i32
    return %c0_i32, %c0_i32_0 : i32, i32
  }
}

</mosaic_0001>

<bundles_post_ra>
// kernel: tpu_custom_call.1
= control target key start
LH: loop header
LB: loop body
LE: loop exit
PB: predicated region body
PF: predicated region fallthrough
CT: control target
= control target key end

     0   :  { %v775_v0 = vmov 1   ;;  %v776_v1 = vmov 0   ;;  %v31_v18 = vlaneseq  ;;  %vm64_vm0 = vcmask 457728   ;;  %s951_s0 = inlined_call_operand.vmem [shape: s32[16,2], index: 0, kind: input, shape index: {}]   ;;  %s952_s1 = inlined_call_operand.vmem [shape: f32[56,8], index: 1, kind: input, shape index: {}]   ;;  %s953_s2 = inlined_call_operand.vmem [shape: f32[40,8], index: 2, kind: input, shape index: {}]   ;;  %s954_s4 = inlined_call_operand.vmem [shape: f32[40,32], index: 4, kind: input, shape index: {}]   ;;  %s955_s3 = inlined_call_operand.vmem [shape: f32[56,32], index: 3, kind: input, shape index: {}]   ;;  %s956_s5 = inlined_call_operand.vmem [shape: f32[32,16], index: 5, kind: input, shape index: {}]   ;;  %s957_s7 = inlined_call_operand.vmem [shape: f32[8,128], index: 7, kind: input, shape index: {}]   ;;  %s958_s6 = inlined_call_operand.vmem [shape: f32[16,8], index: 6, kind: input, shape index: {}]   ;;  %s959_s8 = inlined_call_operand.vmem [shape: f32[16,1], index: 8, kind: output, shape index: {}]  }
   0x1   :  { %773 = vset.pattern.permute.xlu1 %v775_v0  ;;  %772 = vset.pattern.permute.xlu0 %v776_v1  ;;  %v29_v2 = vld [vmem:[%s951_s0] sm:$0xff]  ;;  %v63_v3 = vld [vmem:[%s952_s1 + $0x30] sm:$0xff]  ;;  %v62_v4 = vld [vmem:[%s952_s1 + $0x28] sm:$0xff]  ;;  %vm151_vm1 = vcmask 326656   ;;  %v777_v22 = vmov 0.0   ;;  %vm419_vm6 = vcmask 261120  }
   0x2   :  { %46 = vperm.xlu1 %773, %v29_v2   ;;  %34 = vperm.xlu0 %772, %v29_v2   ;;  %v150_v5 = vld [vmem:[%s953_s2 + $0x20] sm:$0xff]  ;;  %v30_v6 = vld [vmem:[%s951_s0 + $0x8] sm:$0xff]  ;;  %v149_v7 = vld [vmem:[%s953_s2 + $0x18] sm:$0xff]  ;;  %v32_v19 = vand.u32 127, %v31_v18  ;;  %vm509_vm7 = vcmask 130048   ;;  %vm607_vm8 = vcmask 64512  }
   0x3   :  { %691 = vmatprep.subr.mxu0 %v63_v3  ;;  %708 = vmatprep.subr.mxu1 %v150_v5  ;;  %v61_v8 = vld [vmem:[%s952_s1 + $0x20] sm:$0xff]  ;;  %v148_v9 = vld [vmem:[%s953_s2 + $0x10] sm:$0xff]  ;;  %v60_v10 = vld [vmem:[%s952_s1 + $0x18] sm:$0xff]  ;;  %vm620_vm9 = vcmask 7168  }
   0x4   :  { %692 = vmatpush3.msra.mxu0 %v63_v3  ;;  %709 = vmatpush3.msra.mxu1 %v150_v5  ;;  %v147_v11 = vld [vmem:[%s953_s2 + $0x8] sm:$0xff]  ;;  %v59_v12 = vld [vmem:[%s952_s1 + $0x10] sm:$0xff]  ;;  %v146_v13 = vld [vmem:[%s953_s2] sm:$0xff] }
   0x5   :  { %693 = vmatprep.subr.mxu0 %v62_v4  ;;  %710 = vmatprep.subr.mxu1 %v149_v7  ;;  %v58_v14 = vld [vmem:[%s952_s1 + $0x8] sm:$0xff]  ;;  %v252_v15 = vld [vmem:[%s954_s4 + $0x20] sm:$0xff]  ;;  %v247_v17 = vld [vmem:[%s955_s3 + $0x30] sm:$0xff] }
   0x6   :  { %49 = vperm.xlu1 %773, %v30_v6   ;;  %37 = vperm.xlu0 %772, %v30_v6   ;;  %v57_v16 = vld [vmem:[%s952_s1] sm:$0xff]  ;;  %v251_v29 = vld [vmem:[%s954_s4 + $0x18] sm:$0xff]  ;;  %v246_v30 = vld [vmem:[%s955_s3 + $0x28] sm:$0xff] }
   0x7   :  { %694 = vmatpush3.msra.mxu0 %v62_v4  ;;  %711 = vmatpush3.msra.mxu1 %v149_v7  ;;  %v250_v31 = vld [vmem:[%s954_s4 + $0x10] sm:$0xff]  ;;  %v245_v32 = vld [vmem:[%s955_s3 + $0x20] sm:$0xff]  ;;  %v249_v33 = vld [vmem:[%s954_s4 + $0x8] sm:$0xff] }
   0x8   :  { %695 = vmatprep.subr.mxu0 %v61_v8  ;;  %712 = vmatprep.subr.mxu1 %v148_v9  ;;  %v244_v34 = vld [vmem:[%s955_s3 + $0x18] sm:$0xff]  ;;  %v248_v35 = vld [vmem:[%s954_s4] sm:$0xff]  ;;  %v243_v36 = vld [vmem:[%s955_s3 + $0x10] sm:$0xff] }
   0x9   :  { %696 = vmatpush3.msra.mxu0 %v61_v8  ;;  %713 = vmatpush3.msra.mxu1 %v148_v9  ;;  %v242_v37 = vld [vmem:[%s955_s3 + $0x8] sm:$0xff]  ;;  %v241_v38 = vld [vmem:[%s955_s3] sm:$0xff]  ;;  %v414_v39 = vld [vmem:[%s956_s5 + $0x18] sm:$0xff] }
   0xa   :  { %697 = vmatprep.subr.mxu0 %v60_v10  ;;  %714 = vmatprep.subr.mxu1 %v147_v11  ;;  %v413_v40 = vld [vmem:[%s956_s5 + $0x10] sm:$0xff]  ;;  %v412_v41 = vld [vmem:[%s956_s5 + $0x8] sm:$0xff]  ;;  %v411_v42 = vld [vmem:[%s956_s5] sm:$0xff] }
   0xb   :  { %698 = vmatpush3.msra.mxu0 %v60_v10  ;;  %715 = vmatpush3.msra.mxu1 %v147_v11  ;;  %v639_v51 = vld [vmem:[%s957_s7] ss:$0 sm:$0xff]  ;;  %v504_v60 = vld [vmem:[%s958_s6 + $0x8] sm:$0xff]  ;;  %v640_v62 = vld [vmem:[%s957_s7 + $0x1] ss:$0 sm:$0xff] }
   0xc   :  { %699 = vmatprep.subr.mxu0 %v59_v12  ;;  %716 = vmatprep.subr.mxu1 %v146_v13  ;;  %v503_v61 = vld [vmem:[%s958_s6] sm:$0xff] }
   0xd   :  { %700 = vmatpush3.msra.mxu0 %v59_v12  ;;  %717 = vmatpush3.msra.mxu1 %v146_v13  ;;  %v643_v5 = vld [vmem:[%s957_s7 + $0x2] ss:$0 sm:$0xff]  ;;  %v646_v8 = vld [vmem:[%s957_s7 + $0x3] ss:$0 sm:$0xff]  ;;  %v647_v9 = vld [vmem:[%s957_s7 + $0x4] ss:$0 sm:$0xff] }
   0xe   :  { %701 = vmatprep.subr.mxu0 %v58_v14  ;;  %721 = vmatprep.subr.mxu1 %v252_v15 }
   0xf   :  { %702 = vmatpush3.msra.mxu0 %v58_v14  ;;  %774 = vset.pattern.permute.xlu0 %v775_v0 }
  0x10   :  { %703 = vmatprep.subr.mxu0 %v57_v16 }
  0x11   :  { %704 = vmatpush3.msra.mxu0 %v57_v16 }
  0x12   :  { %734 = vmatprep.subr.mxu0 %v247_v17 }
  0x7d   :  { %v47_v20 = vpop.permute.xlu1 %46  ;;  %v35_v21 = vpop.permute.xlu0 %34 }
  0x7e   :  { %vm51_vm2 = vcmp.eq.s32.totalorder %v32_v19, %v47_v20  ;;  %vm39_vm3 = vcmp.eq.s32.totalorder %v32_v19, %v35_v21 }
  0x7f   :  { %v627_v23 = vsel %vm39_vm3, 1.0, %v777_v22  ;;  %v629_v24 = vsel %vm51_vm2, 1.0, %v777_v22 }
  0x80   :  { %705 = vmatprep.mubr.msk.f32.mxu0 %vm64_vm0, %v627_v23  ;;  %718 = vmatprep.mubr.msk.f32.mxu1 %vm151_vm1, %v629_v24 }
  0x81   :  { %v50_v25 = vpop.permute.xlu1 %49  ;;  %v38_v26 = vpop.permute.xlu0 %37 }
  0x82   :  { %vm52_vm4 = vcmp.eq.s32.totalorder %v32_v19, %v50_v25  ;;  %vm40_vm5 = vcmp.eq.s32.totalorder %v32_v19, %v38_v26 }
  0x83   :  { %v630_v27 = vsel %vm52_vm4, 1.0, %v777_v22  ;;  %v628_v28 = vsel %vm40_vm5, 1.0, %v777_v22  ;;  %v648_v22 = vld [vmem:[%s957_s7 + $0x5] ss:$0 sm:$0xff] }
  0x84   :  { %706 = vmatmul.mubr.msk.f32.vlgmr.msra.gmra.mxu0 %vm64_vm0, %v628_v28  ;;  %719 = vmatmul.mubr.msk.f32.vlgmr.msra.gmra.mxu1 %vm151_vm1, %v630_v27 }
  0x85   :  { %722 = vmatpush3.msra.mxu1 %v252_v15  ;;  %735 = vmatpush3.msra.mxu0 %v247_v17 }
  0x86   :  { %723 = vmatprep.subr.mxu1 %v251_v29  ;;  %731 = vmatprep.mubr.msk.f32.mxu1 %vm151_vm1, %v629_v24 }
  0x87   :  { %736 = vmatprep.subr.mxu0 %v246_v30  ;;  %748 = vmatprep.mubr.msk.f32.mxu0 %vm64_vm0, %v627_v23 }
  0x88   :  { %724 = vmatpush3.msra.mxu1 %v251_v29  ;;  %737 = vmatpush3.msra.mxu0 %v246_v30 }
  0x89   :  { %725 = vmatprep.subr.mxu1 %v250_v31  ;;  %738 = vmatprep.subr.mxu0 %v245_v32 }
  0x8a   :  { %726 = vmatpush3.msra.mxu1 %v250_v31  ;;  %739 = vmatpush3.msra.mxu0 %v245_v32 }
  0x8b   :  { %727 = vmatprep.subr.mxu1 %v249_v33  ;;  %740 = vmatprep.subr.mxu0 %v244_v34 }
  0x8c   :  { %728 = vmatpush3.msra.mxu1 %v249_v33  ;;  %741 = vmatpush3.msra.mxu0 %v244_v34 }
  0x8d   :  { %729 = vmatprep.subr.mxu1 %v248_v35  ;;  %742 = vmatprep.subr.mxu0 %v243_v36 }
  0x8e   :  { %730 = vmatpush3.msra.mxu1 %v248_v35  ;;  %743 = vmatpush3.msra.mxu0 %v243_v36 }
  0x8f   :  { %732 = vmatmul.mubr.msk.f32.vlgmr.msra.gmra.mxu1 %vm151_vm1, %v630_v27  ;;  %744 = vmatprep.subr.mxu0 %v242_v37 }
  0x90   :  { %745 = vmatpush3.msra.mxu0 %v242_v37  ;;  %751 = vmatprep.subr.mxu1 %v414_v39 }
  0x91   :  { %746 = vmatprep.subr.mxu0 %v241_v38  ;;  %752 = vmatpush3.msra.mxu1 %v414_v39 }
  0x92   :  { %747 = vmatpush3.msra.mxu0 %v241_v38  ;;  %753 = vmatprep.subr.mxu1 %v413_v40 }
  0x93   :  { %749 = vmatmul.mubr.msk.f32.vlgmr.msra.gmra.mxu0 %vm64_vm0, %v628_v28  ;;  %754 = vmatpush3.msra.mxu1 %v413_v40 }
  0x94   :  { %755 = vmatprep.subr.mxu1 %v412_v41  ;;  %762 = vmatprep.subr.mxu0 %v504_v60 }
  0x95   :  { %756 = vmatpush3.msra.mxu1 %v412_v41  ;;  %763 = vmatpush3.msra.mxu0 %v504_v60 }
  0x96   :  { %757 = vmatprep.subr.mxu1 %v411_v42  ;;  %764 = vmatprep.subr.mxu0 %v503_v61 }
  0x97   :  { %758 = vmatpush3.msra.mxu1 %v411_v42  ;;  %765 = vmatpush3.msra.mxu0 %v503_v61 }
 0x144   :  { %v707_v43 = vpop.f32.mrf.mxu0  ;;  %v720_v44 = vpop.f32.mrf.mxu1 }
 0x145   :  { %v234_v45 = vmul.f32 %v720_v44, %v707_v43 }
 0x146   :  { %v137_v46 = vpop.f32.mrf.mxu0  ;;  %v224_v47 = vpop.f32.mrf.mxu1 }
 0x147   :  { %v233_v48 = vmul.f32 %v224_v47, %v137_v46  ;;  %v598_v13 = vmul.f32 %v646_v8, %v234_v45 }
 0x149   :  { %v597_v16 = vmul.f32 %v646_v8, %v233_v48 }
 0x14f   :  { %v733_v49 = vpop.f32.mrf.mxu1 }
 0x151   :  { %v319_v53 = vpop.f32.mrf.mxu1 }
 0x153   :  { %v750_v50 = vpop.f32.mrf.mxu0 }
 0x154   :  { %v400_v52 = vadd.f32 %v750_v50, %v733_v49 }
 0x155   :  { %v394_v54 = vpop.f32.mrf.mxu0 }
 0x156   :  { %v395_v55 = vadd.f32 %v394_v54, %v319_v53  ;;  %v408_v56 = vadd.f32 %v639_v51, %v400_v52 }
 0x158   :  { %v407_v57 = vadd.f32 %v639_v51, %v395_v55  ;;  %v410_v59 = vmax.f32 %v408_v56, 0.0 }
 0x15a   :  { %v409_v58 = vmax.f32 %v407_v57, 0.0 }
 0x15c   :  { %759 = vmatprep.mubr.msk.f32.mxu1 %vm419_vm6, %v409_v58 }
 0x15d   :  { %760 = vmatmul.mubr.msk.f32.vlgmr.msra.gmra.mxu1 %vm419_vm6, %v410_v59 }
 0x21d   :  { %v761_v63 = vpop.f32.mrf.mxu1 }
 0x21e   :  { %v498_v0 = vadd.f32 %v761_v63, %v640_v62 }
 0x21f   :  { %v492_v1 = vpop.f32.mrf.mxu1 }
 0x220   :  { %v493_v2 = vadd.f32 %v640_v62, %v492_v1  ;;  %v502_v4 = vmax.f32 %v498_v0, 0.0 }
 0x222   :  { %v501_v3 = vmax.f32 %v493_v2, 0.0 }
 0x224   :  { %766 = vmatprep.mubr.msk.f32.mxu0 %vm509_vm7, %v501_v3 }
 0x225   :  { %767 = vmatmul.mubr.msk.f32.vlgmr.msra.gmra.mxu0 %vm509_vm7, %v502_v4 }
 0x2e5   :  { %v768_v6 = vpop.f32.mrf.mxu0 }
 0x2e6   :  { %v588_v7 = vadd.f32 %v768_v6, %v643_v5 }
 0x2e7   :  { %v582_v10 = vpop.f32.mrf.mxu0 }
 0x2e8   :  { %v592_v11 = vmax.f32 %v588_v7, 0.0  ;;  %v583_v12 = vadd.f32 %v643_v5, %v582_v10 }
 0x2ea   :  { %v604_v14 = vmul.f32 %v647_v9, %v592_v11  ;;  %v591_v15 = vmax.f32 %v583_v12, 0.0 }
 0x2ec   :  { %v603_v17 = vmul.f32 %v647_v9, %v591_v15  ;;  %v606_v18 = vadd.f32 %v604_v14, %v598_v13 }
 0x2ee   :  { %v611_v19 = vsel %vm607_vm8, %v606_v18, 0.0  ;;  %v605_v20 = vadd.f32 %v603_v17, %v597_v16 }
 0x2ef   :  { %612 = vadd.xlane.f32.xlu1 %v611_v19 }
 0x2f0   :  { %v608_v21 = vsel %vm607_vm8, %v605_v20, 0.0 }
 0x2f1   :  { %609 = vadd.xlane.f32.xlu0 %v608_v21 }
 0x378   :  { %v613_v23 = vpop.xlane.xlu1 %612 }
 0x379   :  { %v619_v24 = vadd.f32 %v648_v22, %v613_v23 }
 0x37a   :  { %v610_v25 = vpop.xlane.xlu0 %609 }
 0x37b   :  { %622 = vst.msk [vmem:[%s959_s8 + $0x8] sm:$0xff] %vm620_vm9, %v619_v24  ;;  %v618_v26 = vadd.f32 %v648_v22, %v610_v25 }
 0x37d   :  { %621 = vst.msk [vmem:[%s959_s8] sm:$0xff] %vm620_vm9, %v618_v26 }

</bundles_post_ra>
